<compile_context>
chip_gen: v5e
topology: v5e:2x2
jax: 0.10.0
libtpu: 0.0.40
codegen_flags: <defaults>
</compile_context>

<pallas_src>
import jax
import jax.numpy as jnp
from jax.experimental import pallas as pl
from jax.experimental.pallas import tpu as pltpu


def _bhwc2bchw_kernel(x_ref, o_ref):
    # x_ref: (bt, t_hw, tc) VMEM tile, o_ref: (bt, tc, t_hw) VMEM tile.
    # Batched last-two-dim swap lowers to the XLU transpose (vector-extended
    # slot); stores to o_ref are lane-dense along t_hw (multiple of 128).
    o_ref[...] = jnp.transpose(x_ref[...], (0, 2, 1))


def _cdiv(a, b):
    return -(-a // b)


def _round_up(x, m):
    return _cdiv(x, m) * m


def _round_down(x, m):
    return (x // m) * m


def _sublane_granule(itemsize: int) -> int:
    # f32 -> 8, bf16 -> 16, int8/fp8 -> 32 (sub-32-bit dtypes pack along sublanes).
    return max(8, 32 // max(1, itemsize))


def _pair_block_bytes(bt, t_hw, tc, itemsize, g):
    """Layout-aware (padded) VMEM bytes of ONE input + ONE output block."""
    in_b = bt * _round_up(t_hw, g) * _round_up(tc, 128) * itemsize    # lanes = tc
    out_b = bt * _round_up(tc, g) * _round_up(t_hw, 128) * itemsize   # lanes = t_hw
    return in_b + out_b


def _choose_tiles(B, HW, C, itemsize, g, budget):
    """Pick (bt, tc, t_hw): lane-aligned (x128) or full-dim tiles fitting the PADDED budget."""
    hw_cap = max(128, _round_up(HW, 128))

    def max_thw(tc):
        per_row = itemsize * (_round_up(tc, 128) + _round_up(tc, g))
        return min(hw_cap, _round_down(budget // per_row, 128))

    tc = C
    t_hw = max_thw(tc)
    if t_hw < 128 and C > 128:
        # C alone blows the budget: tile channels at a lane-aligned width that
        # still leaves room for a reasonably long spatial tile.
        tc = max(128, min(_round_down(C, 128),
                          _round_down(budget // (2 * 512 * itemsize), 128)))
        t_hw = max_thw(tc)
    t_hw = max(t_hw, 128)
    # Keep the block inside the array unless the whole axis fits in one block.
    if t_hw > HW:
        t_hw = HW if HW <= 128 else _round_down(HW, 128)
    tc = min(tc, C)

    # Fold batches into the block while the PADDED footprint stays in budget.
    per_batch = _pair_block_bytes(1, t_hw, tc, itemsize, g)
    bt = max(1, min(B, budget // max(per_batch, 1)))

    # Megacore (v7x): need >= 2 grid steps so the all-parallel grid can shard
    # across both TensorCores instead of idling one.
    steps = _cdiv(B, bt) * _cdiv(C, tc) * _cdiv(HW, t_hw)
    if steps < 2:
        if B >= 2:
            bt = _cdiv(B, 2)
        elif HW >= 256 and t_hw >= 256:
            t_hw = _round_up(_cdiv(HW, 2), 128)
        elif C >= 256 and tc >= 256:
            tc = _round_up(_cdiv(C, 2), 128)
    return bt, tc, t_hw


def _vmem_capacity_bytes() -> int:
    try:
        return int(pltpu.get_tpu_info().vmem_capacity_bytes)
    except Exception:
        return 64 << 20  # conservative: v7x physical per-TensorCore VMEM


def bhwc2bchw(x: jax.Array, *, block_budget_bytes: int | None = None) -> jax.Array:
    """Pallas TPU implementation of BHWC2BCHW.forward (x.permute([0, 3, 1, 2]))."""
    B, H, W, C = x.shape
    HW = H * W
    itemsize = x.dtype.itemsize
    g = _sublane_granule(itemsize)

    vmem_cap = _vmem_capacity_bytes()
    if block_budget_bytes is None:
        # Generation-dependent: ~8 MiB on 128-MiB-VMEM parts (v5e/v6e),
        # ~4 MiB on v7x (64 MiB per TensorCore).
        block_budget_bytes = vmem_cap // 16

    bt, tc, t_hw = _choose_tiles(B, HW, C, itemsize, g, block_budget_bytes)

    # Double-buffered in+out blocks plus headroom; never request more than 75%
    # of the physical per-core VMEM (leaves room for compiler scratch).
    pair_bytes = _pair_block_bytes(bt, t_hw, tc, itemsize, g)
    vmem_limit = int(min(0.75 * vmem_cap, max(32 << 20, 3 * pair_bytes)))

    grid = (_cdiv(B, bt), _cdiv(C, tc), _cdiv(HW, t_hw))

    # Contiguous (free) reshape: the permute becomes a batched 2-D transpose
    # (HW, C) -> (C, HW) with a lane-dense output layout.
    x2 = x.reshape(B, HW, C)

    y2 = pl.pallas_call(
        _bhwc2bchw_kernel,
        out_shape=jax.ShapeDtypeStruct((B, C, HW), x.dtype),
        grid_spec=pltpu.PrefetchScalarGridSpec(
            num_scalar_prefetch=0,
            grid=grid,
            in_specs=[pl.BlockSpec((bt, t_hw, tc), lambda b, c, j: (b, j, c))],
            out_specs=pl.BlockSpec((bt, tc, t_hw), lambda b, c, j: (b, c, j)),
        ),
        compiler_params=pltpu.CompilerParams(
            dimension_semantics=("parallel", "parallel", "parallel"),
            vmem_limit_bytes=vmem_limit,
        ),
    )(x2)

    # Contiguous (free) reshape back to the 4-D BCHW view.
    return y2.reshape(B, C, H, W)


if __name__ == "__main__":
    key = jax.random.PRNGKey(0)
    # Small BHWC feature map: batch=2, H=16, W=16, C=4.
    x = jax.random.normal(key, (2, 16, 16, 4), dtype=jnp.float32)

    y = jax.block_until_ready(bhwc2bchw(x))

    # Reference check against plain JAX transpose (same semantics as torch.permute).
    y_ref = jnp.transpose(x, (0, 3, 1, 2))
    assert y.shape == (2, 4, 16, 16), y.shape
    assert y.dtype == x.dtype
    assert jnp.array_equal(y, y_ref)

    print("KERNEL_OK")
</pallas_src>

<mosaic_0001>
module attributes {stable_mosaic.version = 11 : i64} {
  func.func @_bhwc2bchw_kernel(%arg0: i32, %arg1: i32, %arg2: i32, %arg3: memref<1x256x4xf32, #tpu.memory_space<vmem>>, %arg4: memref<1x4x256xf32, #tpu.memory_space<vmem>>) attributes {dimension_semantics = [#tpu.dimension_semantics<parallel>, #tpu.dimension_semantics<parallel>, #tpu.dimension_semantics<parallel>], iteration_bounds = array<i64: 2, 1, 1>, scalar_prefetch = 0 : i64, scratch_operands = 0 : i64, tpu.core_type = #tpu.core_type<tc>, window_params = [{transform_indices = @transform_0, window_bounds = array<i64: 1, 256, 4>}, {transform_indices = @transform_1, window_bounds = array<i64: 1, 4, 256>}]} {
    %c0 = arith.constant 0 : index
    %c0_0 = arith.constant 0 : index
    %c0_1 = arith.constant 0 : index
    %0 = vector.load %arg3[%c0, %c0_0, %c0_1] : memref<1x256x4xf32, #tpu.memory_space<vmem>>, vector<1x256x4xf32>
    %1 = tpu.transpose %0, [0, 2, 1] : vector<1x256x4xf32> -> vector<1x4x256xf32>
    %c0_2 = arith.constant 0 : index
    %c0_3 = arith.constant 0 : index
    %c0_4 = arith.constant 0 : index
    %2 = vector.load %arg4[%c0_2, %c0_3, %c0_4] : memref<1x4x256xf32, #tpu.memory_space<vmem>>, vector<1x4x256xf32>
    tpu.vector_store %arg4[%c0_2, %c0_3, %c0_4], %1 {strides = array<i32>} : memref<1x4x256xf32, #tpu.memory_space<vmem>>, vector<1x4x256xf32>,
    return
  }
  func.func @transform_0(%arg0: i32, %arg1: i32, %arg2: i32) -> (i32, i32, i32) {
    %c0_i32 = arith.constant 0 : i32
    return %arg0, %arg2, %arg1 : i32, i32, i32
  }
  func.func @transform_1(%arg0: i32, %arg1: i32, %arg2: i32) -> (i32, i32, i32) {
    %c0_i32 = arith.constant 0 : i32
    return %arg0, %arg1, %arg2 : i32, i32, i32
  }
}

</mosaic_0001>

<bundles_post_ra>
// kernel: tpu_custom_call.1
= control target key start
LH: loop header
LB: loop body
LE: loop exit
PB: predicated region body
PF: predicated region fallthrough
CT: control target
= control target key end

     0   :  { %6 = vsyncpa [#allocation3], 0  ;;  %s665_s0 = inlined_call_operand.vmem [shape: f32[2,256,4], index: 0, kind: input, shape index: {}]   ;;  %s666_s1 = inlined_call_operand.hbm [shape: f32[2,4,256], index: 1, kind: output, shape index: {}]  }
   0x1   :  { %8 = vsyncpa [#allocation3 + $0x1], 0  ;;  %s534_s6 = smov 0   ;;  %s536_s7 = smov 0  }
   0x2   :  { %s538_s8 = smov 0   ;;  %s540_s9 = smov 0  }
   0x3   :  { %s542_s10 = smov 0   ;;  %s544_s11 = smov 0  }
   0x4 LB: > { %s374_s12 = sadd.s32 4294967295, %s522_s11   ;;  %s375_s13 = sadd.s32 4294967294, %s522_s11   ;;  %s522_s11 = sphi %s544_s11, %s14_s11   ;;  %s518_s10 = sphi %s542_s10, %s673_s10   ;;  %s514_s9 = sphi %s540_s9, %s672_s9   ;;  %s510_s8 = sphi %s538_s8, %s671_s8   ;;  %s506_s7 = sphi %s536_s7, %s670_s7   ;;  %s502_s6 = sphi %s534_s6, %s669_s6  }
   0x5   : > { %s33_s14 = sadd.s32 1, %s518_s10  ;;  %s74_s15 = sadd.s32 1, %s510_s8 }
   0x6   : > { %p35_p0 = scmp.ge.s32.totalorder %s33_s14, 2  ;;  %p84_p1 = scmp.ne.s32.totalorder %s510_s8, %s506_s7 }
   0x7   : > { %p85_p2 = scmp.eq.s32.totalorder %s374_s12, 1  ;;  %p90_p3 = scmp.ne.s32.totalorder %s506_s7, %s502_s6 }
   0x8   : > { %s675_s14 = smov (%p35_p0, %s33_s14), 0  ;;  %p91_p5 = scmp.eq.s32.totalorder %s375_s13, 1 }
   0x9   : > { %p574_p4 = por %p85_p2, %p84_p1  ;;  %s67_s17 = ssub.s32 %s518_s10, %s675_s14 }
   0xa   : > { %p378_p6 = scmp.ge.s32.totalorder %s522_s11, 1  ;;  %p72_p7 = scmp.eq.s32.totalorder %s67_s17, 0 }
   0xb   : > { %p581_p8 = por %p91_p5, %p90_p3  ;;  %p125_p9 = scmp.lt.s32.totalorder %s522_s11, 3 }
   0xc   : > { %s587_s19 = scalar_select %p72_p7, %s510_s8, %s74_s15  }
   0xd   : > { %p126_p10 = pnand %p378_p6, %p125_p9 }
   0xe   : > { %p153_p11 = scmp.lt.s32.totalorder (!%p126_p10), %s514_s9, 1  ;;  %s149_s25 = sand.u32 (!%p126_p10), 1, %s506_s7  }
   0xf   : > { %129 = sbr.rel (%p126_p10) target bundleno = 196 (0xc4), region = 24  ;;  %s379_s26 = sshll.u32 (!%p126_p10), %s149_s25, 3 }
  0x10   : > { %s388_s27 = sshll.u32 (!%p126_p10), %s514_s9, 3  ;;  %s151_s2 = scalar_lea.vmem (!%p126_p10), [#allocation2], %s379_s26 }
  0x11   : > { %s285_s30 = scalar_lea.hbm (!%p126_p10), %s666_s1, %s388_s27  ;;  %s287_s3 = sshll.u32 (!%p126_p10), %s151_s2, 4  ;;  %s288_s3 = int_to_ptr.vmem [resolvable:$true] %s287_s3 }
  0x12   : > { %s289_s4 = sshll.u32 (!%p126_p10), %s285_s30, 4  ;;  %s270_s5 = scalar_lea.sflag (!%p126_p10), [#allocation3], %s149_s25  ;;  %s290_s4 = int_to_ptr.hbm [resolvable:$true] %s289_s4 }
  0x13   : > { %s458_s12 = sshra.s32 (!%p126_p10), %s290_s4, 4  ;;  %s464_s17 = scalar_lea.hbm (!%p126_p10), %s666_s1, 16  ;;  %s459_s12 = int_to_ptr.hbm [resolvable:$true] %s458_s12 }
  0x14   : > { %s154_s20 = scalar_select %p153_p11, %s514_s9, 1  ;;  %vm265_vm0 = vcmask 1043456  }
  0x15   : > { %s460_s9 = scalar_lea.hbm %s459_s12, 8  ;;  %p465_p1 = scmp.lt.s32.totalorder %s459_s12, %s666_s1 }
  0x16   : > { %s387_s21 = sshll.u32 %s154_s20, 8  ;;  %p461_p12 = scmp.ne.s32.totalorder %s459_s12, %s460_s9 }
  0x17   : > { %s594_s24 = scalar_lea.vmem %s665_s0, %s387_s21  ;;  %p466_p2 = scmp.lt.s32.totalorder %s464_s17, %s460_s9 }
  0x18   : > { %v182_v0 = vld [vmem:[%s594_s24 + $0x80] sm:$0xff]  ;;  %v183_v2 = vld [vmem:[%s594_s24 + $0x88] sm:$0xff]  ;;  %v184_v4 = vld [vmem:[%s594_s24 + $0x90] sm:$0xff]  ;;  %p462_p13 = pnand %p461_p12, %p574_p4 }
  0x19   : > { %v166_v1 = vld [vmem:[%s594_s24] sm:$0xff]  ;;  %230 = vxpose.xlu1.b32.start [1/16] (narrow) %v182_v0, 8  ;;  %v167_v3 = vld [vmem:[%s594_s24 + $0x8] sm:$0xff]  ;;  %v168_v5 = vld [vmem:[%s594_s24 + $0x10] sm:$0xff]  ;;  %p467_p3 = por %p466_p2, %p465_p1 }
  0x1a   : > { %198 = vxpose.xlu0.b32.start [1/16] (narrow) %v166_v1, 8  ;;  %v185_v6 = vld [vmem:[%s594_s24 + $0x98] sm:$0xff]  ;;  %v186_v8 = vld [vmem:[%s594_s24 + $0xa0] sm:$0xff]  ;;  %v187_v10 = vld [vmem:[%s594_s24 + $0xa8] sm:$0xff]  ;;  %p463_p0 = pneg %p462_p13 }
  0x1b   : > { %v169_v7 = vld [vmem:[%s594_s24 + $0x18] sm:$0xff]  ;;  %v170_v9 = vld [vmem:[%s594_s24 + $0x20] sm:$0xff]  ;;  %v171_v11 = vld [vmem:[%s594_s24 + $0x28] sm:$0xff] }
  0x1c   : > { %v188_v12 = vld [vmem:[%s594_s24 + $0xb0] sm:$0xff]  ;;  %v189_v14 = vld [vmem:[%s594_s24 + $0xb8] sm:$0xff]  ;;  %v190_v16 = vld [vmem:[%s594_s24 + $0xc0] sm:$0xff]  ;;  %p468_p5 = pnand %p467_p3, %p463_p0 }
  0x1d   : > { %v172_v13 = vld [vmem:[%s594_s24 + $0x30] sm:$0xff]  ;;  %v173_v15 = vld [vmem:[%s594_s24 + $0x38] sm:$0xff]  ;;  %v174_v17 = vld [vmem:[%s594_s24 + $0x40] sm:$0xff] }
  0x1e   : > { %v191_v18 = vld [vmem:[%s594_s24 + $0xc8] sm:$0xff]  ;;  %v192_v20 = vld [vmem:[%s594_s24 + $0xd0] sm:$0xff]  ;;  %v193_v22 = vld [vmem:[%s594_s24 + $0xd8] sm:$0xff] }
  0x1f   : > { %v175_v19 = vld [vmem:[%s594_s24 + $0x48] sm:$0xff]  ;;  %v176_v21 = vld [vmem:[%s594_s24 + $0x50] sm:$0xff]  ;;  %v177_v23 = vld [vmem:[%s594_s24 + $0x58] sm:$0xff] }
  0x20   : > { %v194_v24 = vld [vmem:[%s594_s24 + $0xe0] sm:$0xff]  ;;  %v195_v26 = vld [vmem:[%s594_s24 + $0xe8] sm:$0xff]  ;;  %v196_v28 = vld [vmem:[%s594_s24 + $0xf0] sm:$0xff] }
  0x21   : > { %231 = vxpose.xlu1.b32.cont [2/16] (narrow) %v183_v2, 8  ;;  %v178_v25 = vld [vmem:[%s594_s24 + $0x60] sm:$0xff]  ;;  %v179_v27 = vld [vmem:[%s594_s24 + $0x68] sm:$0xff]  ;;  %v180_v29 = vld [vmem:[%s594_s24 + $0x70] sm:$0xff] }
  0x22   : > { %199 = vxpose.xlu0.b32.cont [2/16] (narrow) %v167_v3, 8  ;;  %v197_v30 = vld [vmem:[%s594_s24 + $0xf8] sm:$0xff] }
  0x23   : > { %v181_v31 = vld [vmem:[%s594_s24 + $0x78] sm:$0xff] }
  0x29   : > { %232 = vxpose.xlu1.b32.cont [3/16] (narrow) %v184_v4, 8 }
  0x2a   : > { %200 = vxpose.xlu0.b32.cont [3/16] (narrow) %v168_v5, 8 }
  0x31   : > { %233 = vxpose.xlu1.b32.cont [4/16] (narrow) %v185_v6, 8 }
  0x32   : > { %201 = vxpose.xlu0.b32.cont [4/16] (narrow) %v169_v7, 8 }
  0x39   : > { %234 = vxpose.xlu1.b32.cont [5/16] (narrow) %v186_v8, 8 }
  0x3a   : > { %202 = vxpose.xlu0.b32.cont [5/16] (narrow) %v170_v9, 8 }
  0x41   : > { %235 = vxpose.xlu1.b32.cont [6/16] (narrow) %v187_v10, 8 }
  0x42   : > { %203 = vxpose.xlu0.b32.cont [6/16] (narrow) %v171_v11, 8 }
  0x49   : > { %236 = vxpose.xlu1.b32.cont [7/16] (narrow) %v188_v12, 8 }
  0x4a   : > { %204 = vxpose.xlu0.b32.cont [7/16] (narrow) %v172_v13, 8 }
  0x51   : > { %237 = vxpose.xlu1.b32.cont [8/16] (narrow) %v189_v14, 8 }
  0x52   : > { %205 = vxpose.xlu0.b32.cont [8/16] (narrow) %v173_v15, 8 }
  0x59   : > { %238 = vxpose.xlu1.b32.cont [9/16] (narrow) %v190_v16, 8 }
  0x5a   : > { %206 = vxpose.xlu0.b32.cont [9/16] (narrow) %v174_v17, 8 }
  0x61   : > { %239 = vxpose.xlu1.b32.cont [10/16] (narrow) %v191_v18, 8 }
  0x62   : > { %207 = vxpose.xlu0.b32.cont [10/16] (narrow) %v175_v19, 8 }
  0x69   : > { %240 = vxpose.xlu1.b32.cont [11/16] (narrow) %v192_v20, 8 }
  0x6a   : > { %208 = vxpose.xlu0.b32.cont [11/16] (narrow) %v176_v21, 8 }
  0x71   : > { %241 = vxpose.xlu1.b32.cont [12/16] (narrow) %v193_v22, 8 }
  0x72   : > { %209 = vxpose.xlu0.b32.cont [12/16] (narrow) %v177_v23, 8 }
  0x79   : > { %242 = vxpose.xlu1.b32.cont [13/16] (narrow) %v194_v24, 8 }
  0x7a   : > { %210 = vxpose.xlu0.b32.cont [13/16] (narrow) %v178_v25, 8 }
  0x81   : > { %243 = vxpose.xlu1.b32.cont [14/16] (narrow) %v195_v26, 8 }
  0x82   : > { %211 = vxpose.xlu0.b32.cont [14/16] (narrow) %v179_v27, 8 }
  0x89   : > { %244 = vxpose.xlu1.b32.cont [15/16] (narrow) %v196_v28, 8 }
  0x8a   : > { %212 = vxpose.xlu0.b32.cont [15/16] (narrow) %v180_v29, 8 }
  0x91   : > { %245 = vxpose.xlu1.b32.end [16/16] (narrow) %v197_v30, 8 }
  0x92   : > { %213 = vxpose.xlu0.b32.end [16/16] (narrow) %v181_v31, 8 }
  0xbd   : > { %v246_v32 = vpop.trf.xlu1 }
  0xbe   : > { %v214_v33 = vpop.trf.xlu0  ;;  %v264_v34 = vrot.slane %v246_v32, 4 }
  0xc0   : > { %v266_v35 = vsel %vm265_vm0, %v214_v33, %v264_v34 }
  0xc1   : > { %268 = vst [vmem:[%s151_s2] sm:$0xff] %v266_v35 }
  0xc2   : > { %471 = shalt.err (!%p468_p5)
}
  0xc3   : > { %389 = dma.vmem_to_hbm [thread:$0]  (%p574_p4), %s288_s3, 128, %s290_s4, %s270_s5  }
  0xc4 PF: > { %p395_p6 = scmp.ge.s32.totalorder %s522_s11, 2  ;;  %s301_s22 = sand.u32 1, %s502_s6  }
  0xc5   : > { %s302_s23 = scalar_lea.sflag [#allocation3], %s301_s22 }
  0xc6   : > { %p392_p7 = pnand %p395_p6, %p581_p8 }
  0xc8   : > { %p393_p9 = pneg %p392_p7 }
  0xca   : > { %497 = dma.done.wait (%p393_p9), %s302_s23, 128  }
  0xcb   : > { %499 = vsyncadd (%p393_p9), %s302_s23, 4294967168  ;;  %s14_s11 = sadd.s32 1, %s522_s11   ;;  %s669_s6 = smov %s506_s7 }
  0xcc   : > { %p11_p10 = scmp.ge.s32.totalorder %s14_s11, 4   ;;  %s670_s7 = smov %s510_s8 }
  0xcd   : > { %s671_s8 = smov %s587_s19  ;;  %s672_s9 = smov %s518_s10 }
  0xce   : > { %s673_s10 = smov %s675_s14  ;;  %13 = sbr.rel (!%p11_p10) target bundleno = 4 (0x4), region = 59 }
  0xd3   :  { %308 = vsyncpa [#allocation3], 1 }
  0xd4   :  { %310 = vsyncpa [#allocation3 + $0x1], 1 }

</bundles_post_ra>
